<compile_context>
chip_gen: v5e
topology: v5e:2x2
jax: 0.10.0
libtpu: 0.0.40
codegen_flags: <defaults>
</compile_context>

<pallas_src>
import jax
import jax.numpy as jnp
from jax.experimental import pallas as pl
from jax.experimental.pallas import tpu as pltpu


LANE = 512            # lane-dense tile width: 4 full 128-wide vregs -> unmasked stores
MAX_TILE_ROWS = 1024  # 1024 x 512 x 4 B = 2 MiB per block; 2 bufs x (in+out) = 8 MiB VMEM


def router_kernel(proxy_ref, x_ref, o_ref):
    # proxy_ref: (1,) f32 scalar in SMEM; x_ref / o_ref: (tile_m, LANE) f32 VMEM tiles.
    p = proxy_ref[0]                  # scalar read once; VPU broadcasts across the tile
    o_ref[...] = x_ref[...] + p


def _router_forward_impl(proxy, batch):
    """Pallas 'forward' for Router.

    TODO(synk): the reference Router.forward body is `pass` (returns None); there is
    no real compute to port, so we implement the only parameter-touching op that is
    well defined: batch + proxy (an exact identity for the zero-initialized param).
    """
    orig_shape = batch.shape
    total = batch.size

    # ---- lane-dense layout: flatten, pad, and retile as (rows, LANE), LANE % 128 == 0 ----
    rows = pl.cdiv(total, LANE)
    tile_m = min(rows, MAX_TILE_ROWS)           # either == rows (full dim) or multiple of 8
    padded_rows = pl.cdiv(rows, tile_m) * tile_m
    padded_total = padded_rows * LANE

    flat = batch.reshape(-1)
    if padded_total != total:
        flat = jnp.pad(flat, (0, padded_total - total))
    x2d = flat.reshape(padded_rows, LANE)

    grid = (padded_rows // tile_m,)

    out2d = pl.pallas_call(
        router_kernel,
        out_shape=jax.ShapeDtypeStruct((padded_rows, LANE), batch.dtype),
        grid=grid,
        in_specs=[
            pl.BlockSpec(memory_space=pltpu.MemorySpace.SMEM),   # proxy scalar, whole array
            pl.BlockSpec((tile_m, LANE), lambda i: (i, 0)),      # batch tile (pipelined)
        ],
        out_specs=pl.BlockSpec((tile_m, LANE), lambda i: (i, 0)),
        input_output_aliases={1: 0},  # reuse the (padded) batch HBM buffer for the output
        compiler_params=pltpu.CompilerParams(
            dimension_semantics=("parallel",),   # shard grid across both TCs on v7x
            vmem_limit_bytes=32 * 1024 * 1024,   # explicit; >> 2 * (in + out) block bytes
        ),
    )(proxy, x2d)

    out = out2d.reshape(-1)
    if padded_total != total:
        out = out[:total]
    return out.reshape(orig_shape)


# NOTE: for a standalone broadcast-add, the fastest option overall is a plain
# `batch + proxy` fused by XLA; the Pallas kernel is kept per the exercise and
# structured so it stays at the HBM roofline if the Router grows real compute.
router_forward = jax.jit(_router_forward_impl)


if __name__ == "__main__":
    # Deterministic parameter init, matching nn.Parameter(torch.zeros(1)).
    proxy = jnp.zeros((1,), dtype=jnp.float32)

    # Small synthetic batch consistent with a (vocab, seq, routes) text router:
    # B=2 sentences, S=8 tokens, H=32 hidden features.
    key = jax.random.PRNGKey(0)
    batch = jax.random.normal(key, (2, 8, 32), dtype=jnp.float32)

    out = router_forward(proxy, batch)
    out = jax.block_until_ready(out)

    # With proxy == 0 the kernel is an exact identity on the batch.
    assert out.shape == batch.shape
    assert jnp.allclose(out, batch)

    print("KERNEL_OK")
</pallas_src>

<mosaic_0001>
module attributes {stable_mosaic.version = 11 : i64} {
  func.func @router_kernel(%arg0: i32, %arg1: memref<1xf32, #tpu.memory_space<smem>>, %arg2: memref<1x512xf32, #tpu.memory_space<vmem>>, %arg3: memref<1x512xf32, #tpu.memory_space<vmem>>) attributes {dimension_semantics = [#tpu.dimension_semantics<parallel>], iteration_bounds = array<i64: 1>, scalar_prefetch = 0 : i64, scratch_operands = 0 : i64, tpu.core_type = #tpu.core_type<tc>, window_params = [{transform_indices = @transform_0, window_bounds = array<i64: 1>}, {transform_indices = @transform_1, window_bounds = array<i64: 1, 512>}, {transform_indices = @transform_2, window_bounds = array<i64: 1, 512>}]} {
    %c0 = arith.constant 0 : index
    %0 = memref.load %arg1[%c0] : memref<1xf32, #tpu.memory_space<smem>>
    %c0_0 = arith.constant 0 : index
    %c0_1 = arith.constant 0 : index
    %1 = vector.load %arg2[%c0_0, %c0_1] : memref<1x512xf32, #tpu.memory_space<vmem>>, vector<1x512xf32>
    %2 = vector.broadcast %0 : f32 to vector<1x512xf32>
    %3 = arith.addf %1, %2 : vector<1x512xf32>
    %c0_2 = arith.constant 0 : index
    %c0_3 = arith.constant 0 : index
    %4 = vector.load %arg3[%c0_2, %c0_3] : memref<1x512xf32, #tpu.memory_space<vmem>>, vector<1x512xf32>
    tpu.vector_store %arg3[%c0_2, %c0_3], %3 {strides = array<i32>} : memref<1x512xf32, #tpu.memory_space<vmem>>, vector<1x512xf32>,
    return
  }
  func.func @transform_0(%arg0: i32) -> i32 {
    %c0_i32 = arith.constant 0 : i32
    %c0_i32_0 = arith.constant 0 : i32
    return %c0_i32 : i32
  }
  func.func @transform_1(%arg0: i32) -> (i32, i32) {
    %c0_i32 = arith.constant 0 : i32
    %c0_i32_0 = arith.constant 0 : i32
    return %arg0, %c0_i32 : i32, i32
  }
  func.func @transform_2(%arg0: i32) -> (i32, i32) {
    %c0_i32 = arith.constant 0 : i32
    %c0_i32_0 = arith.constant 0 : i32
    return %arg0, %c0_i32 : i32, i32
  }
}

</mosaic_0001>

<bundles_post_ra>
// kernel: _router_forward_impl.1
= control target key start
LH: loop header
LB: loop body
LE: loop exit
PB: predicated region body
PF: predicated region fallthrough
CT: control target
= control target key end

     0   :  { %v16_v0 = vlaneseq  ;;  %s49_s0 = inlined_call_operand.<no memory space> [shape: f32[1], index: 0, kind: input, shape index: {}]   ;;  %s50_s1 = inlined_call_operand.vmem [shape: f32[1,512], index: 1, kind: input, shape index: {}, may-alias: {1,2}]   ;;  %s51_s2 = inlined_call_operand.vmem [shape: f32[1,512], index: 2, kind: output, shape index: {}, may-alias: {1,2}]  }
   0x1   :  { %v13_v1 = vld [vmem:[%s50_s1] sm:$0xf]  ;;  %v14_v2 = vstv %s49_s0 }
   0x2   :  { %v15_v3 = vadd.f32 %v14_v2, %v13_v1  ;;  %vm18_vm0 = vcmp.lt.s32.totalorder %v16_v0, 512 }
   0x4   :  { %20 = vst.msk [vmem:[%s51_s2] sm:$0xf] %vm18_vm0, %v15_v3 }

</bundles_post_ra>
